<compile_context>
chip_gen: v6e
topology: v6e:2x2x1
jax: 0.10.0
libtpu: 0.0.40
codegen_flags: <defaults>
</compile_context>

<pallas_src>
import functools

import jax
import jax.numpy as jnp
from jax.experimental import pallas as pl
from jax.experimental.pallas import tpu as pltpu

_EPS = 1e-5
_VMEM_LIMIT = 32 * 1024 * 1024  # explicit scoped-VMEM budget (fits v5e/v6e/v7x)


def _choose_tile_l(n, c, l, itemsize, target_bytes=2 << 20):
    """Lane-dim tile: multiple of 128 (or full l when l <= 128), ~2 MiB block."""
    if l <= 128:
        return l
    per_128 = n * c * 128 * itemsize
    max_mult = max(1, min(l // 128, target_bytes // max(1, per_128)))
    # Prefer a tile that divides l exactly (avoids masking of a partial tile).
    for m in range(max_mult, 0, -1):
        if l % (m * 128) == 0:
            return m * 128
    return max_mult * 128


def _stats_kernel(x_ref, gamma_ref, beta_ref, scale_ref, shift_ref, *,
                  inv_count, l_total, tile_l, eps, needs_mask):
    li = pl.program_id(0)

    @pl.when(li == 0)
    def _init():
        scale_ref[...] = jnp.zeros_like(scale_ref)   # running sum(x)
        shift_ref[...] = jnp.zeros_like(shift_ref)   # running sum(x*x)

    x = x_ref[...].astype(jnp.float32)               # (N, C, TILE_L)
    if needs_mask:
        lane = jax.lax.broadcasted_iota(jnp.int32, x.shape, dimension=2)
        x = jnp.where(li * tile_l + lane < l_total, x, 0.0)

    part = jnp.sum(x, axis=2, keepdims=True)         # (N, C, 1) lane reduce
    part_sq = jnp.sum(x * x, axis=2, keepdims=True)
    scale_ref[...] += jnp.sum(part, axis=0, keepdims=True)      # (1, C, 1)
    shift_ref[...] += jnp.sum(part_sq, axis=0, keepdims=True)

    @pl.when(li == pl.num_programs(0) - 1)
    def _finalize():
        mean = scale_ref[...] * inv_count
        var = shift_ref[...] * inv_count - mean * mean           # biased var
        inv_std = jax.lax.rsqrt(var + eps)
        scale = gamma_ref[...].astype(jnp.float32) * inv_std
        scale_ref[...] = scale
        shift_ref[...] = beta_ref[...].astype(jnp.float32) - mean * scale


def _norm_kernel(x_ref, scale_ref, shift_ref, o_ref):
    x = x_ref[...].astype(jnp.float32)
    o_ref[...] = (x * scale_ref[...] + shift_ref[...]).astype(o_ref.dtype)


def as_batchnorm2d(x_nchw, gamma, beta, eps=_EPS):
    """Forward of ASBatchNorm2d (use_ann branch). x_nchw: (N, C, H, W)."""
    n, c, h, w = x_nchw.shape
    l = h * w
    x3d = x_nchw.reshape(n, c, l)                    # contiguous view, no copy
    gamma3d = gamma.reshape(1, c, 1).astype(jnp.float32)
    beta3d = beta.reshape(1, c, 1).astype(jnp.float32)

    itemsize = jnp.dtype(x_nchw.dtype).itemsize
    tile_l = _choose_tile_l(n, c, l, itemsize)
    num_tiles = pl.cdiv(l, tile_l)
    needs_mask = (l % tile_l) != 0

    x_spec = pl.BlockSpec((n, c, tile_l), lambda i: (0, 0, i))
    cvec_spec = pl.BlockSpec((1, c, 1), lambda i: (0, 0, 0))

    # Pass 1: streamed per-channel stats, folded into (scale, shift).
    scale, shift = pl.pallas_call(
        functools.partial(
            _stats_kernel,
            inv_count=1.0 / float(n * l),
            l_total=l, tile_l=tile_l, eps=float(eps), needs_mask=needs_mask),
        out_shape=(jax.ShapeDtypeStruct((1, c, 1), jnp.float32),
                   jax.ShapeDtypeStruct((1, c, 1), jnp.float32)),
        grid=(num_tiles,),
        in_specs=[x_spec, cvec_spec, cvec_spec],
        out_specs=(cvec_spec, cvec_spec),
        compiler_params=pltpu.CompilerParams(
            dimension_semantics=("arbitrary",),
            vmem_limit_bytes=_VMEM_LIMIT),
    )(x3d, gamma3d, beta3d)

    # Pass 2: streamed y = x * scale + shift (independent tiles -> parallel).
    out3d = pl.pallas_call(
        _norm_kernel,
        out_shape=jax.ShapeDtypeStruct((n, c, l), x_nchw.dtype),
        grid=(num_tiles,),
        in_specs=[x_spec, cvec_spec, cvec_spec],
        out_specs=x_spec,
        compiler_params=pltpu.CompilerParams(
            dimension_semantics=("parallel",),
            vmem_limit_bytes=_VMEM_LIMIT),
    )(x3d, scale, shift)

    return out3d.reshape(n, c, h, w)


def _reference(x_nchw, gamma, beta, eps=_EPS):
    x = x_nchw.astype(jnp.float32)
    mean = jnp.mean(x, axis=(0, 2, 3), keepdims=True)
    var = jnp.mean((x - mean) ** 2, axis=(0, 2, 3), keepdims=True)
    g = gamma.reshape(1, -1, 1, 1)
    b = beta.reshape(1, -1, 1, 1)
    return ((x - mean) * jax.lax.rsqrt(var + eps) * g + b).astype(x_nchw.dtype)


if __name__ == "__main__":
    key = jax.random.PRNGKey(0)
    N, C, H, W = 2, 4, 16, 16
    x = jax.random.normal(key, (N, C, H, W), dtype=jnp.float32)

    # nn.BatchNorm2d defaults: weight = ones(C), bias = zeros(C), eps = 1e-5.
    gamma = jnp.ones((C,), dtype=jnp.float32)
    beta = jnp.zeros((C,), dtype=jnp.float32)

    # TODO(synk): running_mean/running_var buffer updates (training bookkeeping)
    # are not modeled; they do not affect the returned tensor.
    out = as_batchnorm2d(x, gamma, beta)
    out = jax.block_until_ready(out)

    ref = _reference(x, gamma, beta)
    assert out.shape == (N, C, H, W)
    assert jnp.max(jnp.abs(out - ref)) < 1e-4

    print("KERNEL_OK")
</pallas_src>

<mosaic_0001>
module attributes {stable_mosaic.version = 11 : i64} {
  func.func @_stats_kernel(%arg0: i32, %arg1: memref<2x4x256xf32, #tpu.memory_space<vmem>>, %arg2: memref<1x4x1xf32, #tpu.memory_space<vmem>>, %arg3: memref<1x4x1xf32, #tpu.memory_space<vmem>>, %arg4: memref<1x4x1xf32, #tpu.memory_space<vmem>>, %arg5: memref<1x4x1xf32, #tpu.memory_space<vmem>>) attributes {dimension_semantics = [#tpu.dimension_semantics<arbitrary>], iteration_bounds = array<i64: 1>, scalar_prefetch = 0 : i64, scratch_operands = 0 : i64, tpu.core_type = #tpu.core_type<tc>, window_params = [{transform_indices = @transform_0, window_bounds = array<i64: 2, 4, 256>}, {pipeline_mode = #tpu.pipeline_mode<synchronous>, transform_indices = @transform_1, window_bounds = array<i64: 1, 4, 1>}, {pipeline_mode = #tpu.pipeline_mode<synchronous>, transform_indices = @transform_2, window_bounds = array<i64: 1, 4, 1>}, {pipeline_mode = #tpu.pipeline_mode<synchronous>, transform_indices = @transform_3, window_bounds = array<i64: 1, 4, 1>}, {pipeline_mode = #tpu.pipeline_mode<synchronous>, transform_indices = @transform_4, window_bounds = array<i64: 1, 4, 1>}]} {
    %c0_i32 = arith.constant 0 : i32
    %0 = arith.cmpi eq, %arg0, %c0_i32 : i32
    %1 = arith.extui %0 : i1 to i32
    %c0_i32_0 = arith.constant 0 : i32
    %2 = arith.cmpi ne, %1, %c0_i32_0 : i32
    scf.if %2 {
      %cst_20 = arith.constant 0.000000e+00 : f32
      %22 = vector.broadcast %cst_20 : f32 to vector<1x4x1xf32>
      %c0_21 = arith.constant 0 : index
      %c0_22 = arith.constant 0 : index
      %c0_23 = arith.constant 0 : index
      %23 = vector.load %arg4[%c0_21, %c0_22, %c0_23] : memref<1x4x1xf32, #tpu.memory_space<vmem>>, vector<1x4x1xf32>
      tpu.vector_store %arg4[%c0_21, %c0_22, %c0_23], %22 {strides = array<i32>} : memref<1x4x1xf32, #tpu.memory_space<vmem>>, vector<1x4x1xf32>,
      %cst_24 = arith.constant 0.000000e+00 : f32
      %24 = vector.broadcast %cst_24 : f32 to vector<1x4x1xf32>
      %c0_25 = arith.constant 0 : index
      %c0_26 = arith.constant 0 : index
      %c0_27 = arith.constant 0 : index
      %25 = vector.load %arg5[%c0_25, %c0_26, %c0_27] : memref<1x4x1xf32, #tpu.memory_space<vmem>>, vector<1x4x1xf32>
      tpu.vector_store %arg5[%c0_25, %c0_26, %c0_27], %24 {strides = array<i32>} : memref<1x4x1xf32, #tpu.memory_space<vmem>>, vector<1x4x1xf32>,
    } else {
    }
    %c0 = arith.constant 0 : index
    %c0_1 = arith.constant 0 : index
    %c0_2 = arith.constant 0 : index
    %3 = vector.load %arg1[%c0, %c0_1, %c0_2] : memref<2x4x256xf32, #tpu.memory_space<vmem>>, vector<2x4x256xf32>
    %cst = arith.constant dense<0.000000e+00> : vector<2x4xf32>
    %4 = vector.multi_reduction <add>, %3, %cst [2] : vector<2x4x256xf32> to vector<2x4xf32>
    %5 = vector.shape_cast %4 : vector<2x4xf32> to vector<2x4x1xf32>
    %6 = arith.mulf %3, %3 : vector<2x4x256xf32>
    %cst_3 = arith.constant dense<0.000000e+00> : vector<2x4xf32>
    %7 = vector.multi_reduction <add>, %6, %cst_3 [2] : vector<2x4x256xf32> to vector<2x4xf32>
    %8 = vector.shape_cast %7 : vector<2x4xf32> to vector<2x4x1xf32>
    %c0_4 = arith.constant 0 : index
    %c0_5 = arith.constant 0 : index
    %c0_6 = arith.constant 0 : index
    %9 = vector.load %arg4[%c0_4, %c0_5, %c0_6] : memref<1x4x1xf32, #tpu.memory_space<vmem>>, vector<1x4x1xf32>
    %cst_7 = arith.constant dense<0.000000e+00> : vector<4x1xf32>
    %10 = vector.multi_reduction <add>, %5, %cst_7 [0] : vector<2x4x1xf32> to vector<4x1xf32>
    %11 = vector.shape_cast %10 : vector<4x1xf32> to vector<1x4x1xf32>
    %12 = arith.addf %9, %11 : vector<1x4x1xf32>
    %c0_8 = arith.constant 0 : index
    %c0_9 = arith.constant 0 : index
    %c0_10 = arith.constant 0 : index
    %13 = vector.load %arg4[%c0_8, %c0_9, %c0_10] : memref<1x4x1xf32, #tpu.memory_space<vmem>>, vector<1x4x1xf32>
    tpu.vector_store %arg4[%c0_8, %c0_9, %c0_10], %12 {strides = array<i32>} : memref<1x4x1xf32, #tpu.memory_space<vmem>>, vector<1x4x1xf32>,
    %c0_11 = arith.constant 0 : index
    %c0_12 = arith.constant 0 : index
    %c0_13 = arith.constant 0 : index
    %14 = vector.load %arg5[%c0_11, %c0_12, %c0_13] : memref<1x4x1xf32, #tpu.memory_space<vmem>>, vector<1x4x1xf32>
    %cst_14 = arith.constant dense<0.000000e+00> : vector<4x1xf32>
    %15 = vector.multi_reduction <add>, %8, %cst_14 [0] : vector<2x4x1xf32> to vector<4x1xf32>
    %16 = vector.shape_cast %15 : vector<4x1xf32> to vector<1x4x1xf32>
    %17 = arith.addf %14, %16 : vector<1x4x1xf32>
    %c0_15 = arith.constant 0 : index
    %c0_16 = arith.constant 0 : index
    %c0_17 = arith.constant 0 : index
    %18 = vector.load %arg5[%c0_15, %c0_16, %c0_17] : memref<1x4x1xf32, #tpu.memory_space<vmem>>, vector<1x4x1xf32>
    tpu.vector_store %arg5[%c0_15, %c0_16, %c0_17], %17 {strides = array<i32>} : memref<1x4x1xf32, #tpu.memory_space<vmem>>, vector<1x4x1xf32>,
    %c0_i32_18 = arith.constant 0 : i32
    %19 = arith.cmpi eq, %arg0, %c0_i32_18 : i32
    %20 = arith.extui %19 : i1 to i32
    %c0_i32_19 = arith.constant 0 : i32
    %21 = arith.cmpi ne, %20, %c0_i32_19 : i32
    scf.if %21 {
      %c0_20 = arith.constant 0 : index
      %c0_21 = arith.constant 0 : index
      %c0_22 = arith.constant 0 : index
      %22 = vector.load %arg4[%c0_20, %c0_21, %c0_22] : memref<1x4x1xf32, #tpu.memory_space<vmem>>, vector<1x4x1xf32>
      %cst_23 = arith.constant 0.001953125 : f32
      %23 = vector.broadcast %cst_23 : f32 to vector<1x4x1xf32>
      %24 = arith.mulf %22, %23 : vector<1x4x1xf32>
      %c0_24 = arith.constant 0 : index
      %c0_25 = arith.constant 0 : index
      %c0_26 = arith.constant 0 : index
      %25 = vector.load %arg5[%c0_24, %c0_25, %c0_26] : memref<1x4x1xf32, #tpu.memory_space<vmem>>, vector<1x4x1xf32>
      %cst_27 = arith.constant 0.001953125 : f32
      %26 = vector.broadcast %cst_27 : f32 to vector<1x4x1xf32>
      %27 = arith.mulf %25, %26 : vector<1x4x1xf32>
      %28 = arith.mulf %24, %24 : vector<1x4x1xf32>
      %29 = arith.subf %27, %28 : vector<1x4x1xf32>
      %cst_28 = arith.constant 9.99999974E-6 : f32
      %30 = vector.broadcast %cst_28 : f32 to vector<1x4x1xf32>
      %31 = arith.addf %29, %30 : vector<1x4x1xf32>
      %32 = math.rsqrt %31 : vector<1x4x1xf32>
      %c0_29 = arith.constant 0 : index
      %c0_30 = arith.constant 0 : index
      %c0_31 = arith.constant 0 : index
      %33 = vector.load %arg2[%c0_29, %c0_30, %c0_31] : memref<1x4x1xf32, #tpu.memory_space<vmem>>, vector<1x4x1xf32>
      %34 = arith.mulf %33, %32 : vector<1x4x1xf32>
      %c0_32 = arith.constant 0 : index
      %c0_33 = arith.constant 0 : index
      %c0_34 = arith.constant 0 : index
      %35 = vector.load %arg4[%c0_32, %c0_33, %c0_34] : memref<1x4x1xf32, #tpu.memory_space<vmem>>, vector<1x4x1xf32>
      tpu.vector_store %arg4[%c0_32, %c0_33, %c0_34], %34 {strides = array<i32>} : memref<1x4x1xf32, #tpu.memory_space<vmem>>, vector<1x4x1xf32>,
      %c0_35 = arith.constant 0 : index
      %c0_36 = arith.constant 0 : index
      %c0_37 = arith.constant 0 : index
      %36 = vector.load %arg3[%c0_35, %c0_36, %c0_37] : memref<1x4x1xf32, #tpu.memory_space<vmem>>, vector<1x4x1xf32>
      %37 = arith.mulf %24, %34 : vector<1x4x1xf32>
      %38 = arith.subf %36, %37 : vector<1x4x1xf32>
      %c0_38 = arith.constant 0 : index
      %c0_39 = arith.constant 0 : index
      %c0_40 = arith.constant 0 : index
      %39 = vector.load %arg5[%c0_38, %c0_39, %c0_40] : memref<1x4x1xf32, #tpu.memory_space<vmem>>, vector<1x4x1xf32>
      tpu.vector_store %arg5[%c0_38, %c0_39, %c0_40], %38 {strides = array<i32>} : memref<1x4x1xf32, #tpu.memory_space<vmem>>, vector<1x4x1xf32>,
    } else {
    }
    return
  }
  func.func @transform_0(%arg0: i32) -> (i32, i32, i32) {
    %c0_i32 = arith.constant 0 : i32
    %c0_i32_0 = arith.constant 0 : i32
    %c0_i32_1 = arith.constant 0 : i32
    return %c0_i32, %c0_i32_0, %arg0 : i32, i32, i32
  }
  func.func @transform_1(%arg0: i32) -> (i32, i32, i32) {
    %c0_i32 = arith.constant 0 : i32
    %c0_i32_0 = arith.constant 0 : i32
    %c0_i32_1 = arith.constant 0 : i32
    %c0_i32_2 = arith.constant 0 : i32
    return %c0_i32, %c0_i32_0, %c0_i32_1 : i32, i32, i32
  }
  func.func @transform_2(%arg0: i32) -> (i32, i32, i32) {
    %c0_i32 = arith.constant 0 : i32
    %c0_i32_0 = arith.constant 0 : i32
    %c0_i32_1 = arith.constant 0 : i32
    %c0_i32_2 = arith.constant 0 : i32
    return %c0_i32, %c0_i32_0, %c0_i32_1 : i32, i32, i32
  }
  func.func @transform_3(%arg0: i32) -> (i32, i32, i32) {
    %c0_i32 = arith.constant 0 : i32
    %c0_i32_0 = arith.constant 0 : i32
    %c0_i32_1 = arith.constant 0 : i32
    %c0_i32_2 = arith.constant 0 : i32
    return %c0_i32, %c0_i32_0, %c0_i32_1 : i32, i32, i32
  }
  func.func @transform_4(%arg0: i32) -> (i32, i32, i32) {
    %c0_i32 = arith.constant 0 : i32
    %c0_i32_0 = arith.constant 0 : i32
    %c0_i32_1 = arith.constant 0 : i32
    %c0_i32_2 = arith.constant 0 : i32
    return %c0_i32, %c0_i32_0, %c0_i32_1 : i32, i32, i32
  }
}

</mosaic_0001>

<bundles_post_ra>
// kernel: tpu_custom_call.1
= control target key start
LH: loop header
LB: loop body
LE: loop exit
PB: predicated region body
PF: predicated region fallthrough
CT: control target
= control target key end

     0   :  { %10 = vsyncpa [#allocation3], 0  ;;  %s144_s15 = smov [#allocation2]   ;;  %s230_s0 = inlined_call_operand.hbm [shape: f32[2,4,256], index: 0, kind: input, shape index: {}]   ;;  %s231_s1 = inlined_call_operand.vmem [shape: f32[1,4,1], index: 1, kind: input, shape index: {}]   ;;  %s232_s2 = inlined_call_operand.vmem [shape: f32[1,4,1], index: 2, kind: input, shape index: {}]   ;;  %s233_s3 = inlined_call_operand.vmem [shape: f32[1,4,1], index: 3, kind: output, shape index: {0}]   ;;  %s234_s4 = inlined_call_operand.vmem [shape: f32[1,4,1], index: 4, kind: output, shape index: {1}]  }
   0x1   :  { %s16_s16 = sshll.u32 %s144_s15, 4  ;;  %s17_s16 = int_to_ptr.vmem [resolvable:$true] %s16_s16 }
   0x2   :  { %s130_s17 = scalar_lea.vmem %s17_s16, 256  ;;  %p135_p1 = scmp.lt.s32.totalorder %s17_s16, %s17_s16 }
   0x3   :  { %p131_p0 = scmp.ne.s32.totalorder %s17_s16, %s130_s17  ;;  %p136_p2 = scmp.lt.s32.totalorder %s130_s17, %s130_s17 }
   0x5   :  { %p137_p3 = por %p136_p2, %p135_p1 }
   0x7   :  { %p138_p4 = pnand %p137_p3, %p131_p0 }
   0x9   :  { %141 = shalt.err (!%p138_p4)
}
   0xa   :  { %s145_s18 = smov 128   ;;  %s146_s19 = smov 8  }
   0xb   :  { %22 = dma.hbm_to_vmem [thread:$0]  %s230_s0, 256, %s17_s16, [#allocation3], %s145_s18, %s145_s18, %s146_s19  }
   0xc   :  { %142 = dma.done.wait [#allocation3], 256  }
   0xd   :  { %143 = vsyncadd [#allocation3], 4294967040  ;;  %vm45_vm0 = vcmask 1043456   ;;  %v37_v0 = vld [vmem:[#allocation2] sm:$0xff]  ;;  %v38_v1 = vld [vmem:[#allocation2 + $0x8] sm:$0xff]  ;;  %vm34_vm1 = vcmask 3072  }
   0xe   :  { %v41_v2 = vcombine.high %v37_v0, %v37_v0  ;;  %v46_v3 = vsel %vm45_vm0, %v37_v0, 0.0  ;;  %v56_v4 = vmul.f32 %v37_v0, %v37_v0  ;;  %v42_v5 = vcombine.high %v38_v1, %v38_v1  ;;  %v98_v42 = vld [vmem:[%s231_s1] sm:$0xf] }
   0xf   :  { %v51_v6 = vsel %vm45_vm0, %v38_v1, 0.0  ;;  %v57_v7 = vmul.f32 %v38_v1, %v38_v1  ;;  %v147_v20 = vmov 0.0   ;;  %v101_v45 = vld [vmem:[%s232_s2] sm:$0xf] }
  0x10   :  { %v47_v8 = vsel %vm45_vm0, %v41_v2, 0.0  ;;  %v60_v9 = vcombine.high %v56_v4, %v56_v4  ;;  %v64_v10 = vsel %vm45_vm0, %v56_v4, 0.0  ;;  %v52_v11 = vsel %vm45_vm0, %v42_v5, 0.0  ;;  %35 = vst.msk [vmem:[%s233_s3] sm:$0xf] %vm34_vm1, %v147_v20 }
  0x11   :  { %v48_v12 = vadd.f32 %v47_v8, %v46_v3  ;;  %v61_v13 = vcombine.high %v57_v7, %v57_v7  ;;  %v69_v15 = vsel %vm45_vm0, %v57_v7, 0.0  ;;  %v53_v17 = vadd.f32 %v52_v11, %v51_v6  ;;  %36 = vst.msk [vmem:[%s234_s4] sm:$0xf] %vm34_vm1, %v147_v20 }
  0x12   :  { %v65_v14 = vsel %vm45_vm0, %v60_v9, 0.0 }
  0x13   :  { %49 = vadd.xlane.f32.xlu0 %v48_v12  ;;  %v66_v16 = vadd.f32 %v65_v14, %v64_v10  ;;  %v70_v18 = vsel %vm45_vm0, %v61_v13, 0.0 }
  0x14   :  { %v71_v19 = vadd.f32 %v70_v18, %v69_v15 }
  0x15   :  { %67 = vadd.xlane.f32.xlu1 %v66_v16 }
  0x17   :  { %54 = vadd.xlane.f32.xlu0 %v53_v17  ;;  %v74_v25 = vld [vmem:[%s233_s3] sm:$0xf] }
  0x18   :  { %v81_v30 = vld [vmem:[%s234_s4] sm:$0xf] }
  0x19   :  { %72 = vadd.xlane.f32.xlu1 %v71_v19 }
  0x9c   :  { %v50_v21 = vpop.xlane.xlu0 %49 }
  0x9d   :  { %v75_v24 = vsel %vm45_vm0, %v50_v21, 0.0 }
  0x9e   :  { %v68_v22 = vpop.xlane.xlu1 %67 }
  0x9f   :  { %v82_v29 = vsel %vm45_vm0, %v68_v22, 0.0 }
  0xa0   :  { %v55_v23 = vpop.xlane.xlu0 %54 }
  0xa1   :  { %v76_v26 = vsel %vm45_vm0, %v55_v23, 0.0 }
  0xa2   :  { %v77_v27 = vadd.f32 %v76_v26, %v75_v24  ;;  %v73_v28 = vpop.xlane.xlu1 %72 }
  0xa3   :  { %v83_v31 = vsel %vm45_vm0, %v73_v28, 0.0 }
  0xa4   :  { %v78_v32 = vadd.f32 %v77_v27, %v74_v25  ;;  %v84_v33 = vadd.f32 %v83_v31, %v82_v29 }
  0xa6   :  { %80 = vst.msk [vmem:[%s233_s3] sm:$0xf] %vm34_vm1, %v78_v32  ;;  %v85_v34 = vadd.f32 %v84_v33, %v81_v30 }
  0xa8   :  { %86 = vst.msk [vmem:[%s234_s4] sm:$0xf] %vm34_vm1, %v85_v34 }
  0xad   :  { %v90_v35 = vld [vmem:[%s233_s3] sm:$0xf] }
  0xae   :  { %v91_v36 = vmul.f32 0.001953125, %v90_v35 }
  0xaf   :  { %v92_v37 = vld [vmem:[%s234_s4] sm:$0xf] }
  0xb0   :  { %v93_v38 = vmul.f32 0.001953125, %v92_v37  ;;  %v94_v39 = vmul.f32 %v91_v36, %v91_v36 }
  0xb2   :  { %v95_v40 = vsub.f32 %v93_v38, %v94_v39 }
  0xb4   :  { %v96_v41 = vadd.f32 1e-05, %v95_v40 }
  0xb6   :  { %120 = vrsqrt.f32 %v96_v41 }
  0xc3   :  { %v121_v43 = vpop.eup %120 }
  0xc4   :  { %v99_v44 = vmul.f32 %v121_v43, %v98_v42 }
  0xc6   :  { %100 = vst.msk [vmem:[%s233_s3] sm:$0xf] %vm34_vm1, %v99_v44  ;;  %v102_v46 = vmul.f32 %v99_v44, %v91_v36 }
  0xc8   :  { %v103_v47 = vsub.f32 %v101_v45, %v102_v46 }
  0xca   :  { %104 = vst.msk [vmem:[%s234_s4] sm:$0xf] %vm34_vm1, %v103_v47 }
  0xcb   :  { %113 = vsyncpa [#allocation3], 1 }

</bundles_post_ra>
